<compile_context>
chip_gen: v6e
topology: v6e:2x2x1
jax: 0.10.0
libtpu: 0.0.40
codegen_flags: <defaults>
</compile_context>

<pallas_src>
import functools
import math

import jax
import jax.numpy as jnp
from jax.experimental import pallas as pl
from jax.experimental.pallas import tpu as pltpu


def _layer_norm_kernel(eps, d_real, x_ref, g_ref, b_ref, o_ref):
    """x_ref: (tm, Dp); g_ref/b_ref: (1, Dp); o_ref: (tm, Dp). Dp >= d_real."""
    x = x_ref[...].astype(jnp.float32)                      # (tm, Dp)
    d_pad = x.shape[-1]

    # Padded lanes of x are zero, so the raw sum equals the sum over real lanes.
    mean = jnp.sum(x, axis=-1, keepdims=True) * (1.0 / d_real)      # (tm, 1)
    xc = x - mean

    if d_pad != d_real:
        lane = jax.lax.broadcasted_iota(jnp.int32, x.shape, dimension=1)
        xc_sq = jnp.where(lane < d_real, xc * xc, 0.0)      # mask padded lanes
    else:
        xc_sq = xc * xc

    # torch.Tensor.std defaults to the unbiased estimator: divide by (D - 1).
    var = jnp.sum(xc_sq, axis=-1, keepdims=True) * (1.0 / max(d_real - 1, 1))
    std = jnp.sqrt(var)
    inv = 1.0 / (std + eps)                                 # eps on std (torch)

    y = xc * inv * g_ref[...].astype(jnp.float32) + b_ref[...].astype(jnp.float32)
    o_ref[...] = y.astype(o_ref.dtype)


def _choose_block_rows(n_rows, d_pad, itemsize, *, budget_bytes, min_steps):
    """Row tile sized by VMEM bytes, sublane-rounded, with >= min_steps grid steps."""
    sublane = {4: 8, 2: 16, 1: 32}.get(itemsize, 8)
    # Target: one x tile ~= budget_bytes (pipelined footprint ~4x that).
    tm_budget = max(budget_bytes // (d_pad * itemsize), sublane)
    # Prefer at least `min_steps` grid steps so the parallel axis can use both
    # TensorCores on v7x (harmless elsewhere).
    tm_split = pl.cdiv(n_rows, min_steps)
    tm = min(tm_budget, tm_split, max(n_rows, 1))
    tm = max((tm // sublane) * sublane, sublane)
    return int(tm)


def layer_norm(x, a_2, b_2, *, eps=1e-6,
               x_tile_budget_bytes=6 << 20, min_grid_steps=2):
    """Pallas LayerNorm forward.

    x:   [..., D] input
    a_2: [D] scale (gamma), b_2: [D] shift (beta)
    """
    orig_shape = x.shape
    D = orig_shape[-1]
    N = int(math.prod(orig_shape[:-1])) if len(orig_shape) > 1 else 1
    itemsize = jnp.dtype(x.dtype).itemsize

    x2 = x.reshape(N, D)
    g2 = a_2.reshape(1, D)
    b2 = b_2.reshape(1, D)

    # Lane-dense output: pad D up to a multiple of 128 (gamma->1, beta->0).
    Dp = max(128, ((D + 127) // 128) * 128)
    if Dp != D:
        x2 = jnp.pad(x2, ((0, 0), (0, Dp - D)))
        g2 = jnp.pad(g2, ((0, 0), (0, Dp - D)), constant_values=1)
        b2 = jnp.pad(b2, ((0, 0), (0, Dp - D)))

    tm = _choose_block_rows(N, Dp, itemsize,
                            budget_bytes=x_tile_budget_bytes,
                            min_steps=min_grid_steps)

    # cdiv grid + row padding: tm does not need to divide N.
    n_steps = pl.cdiv(N, tm)
    Np = n_steps * tm
    if Np != N:
        x2 = jnp.pad(x2, ((0, Np - N), (0, 0)))

    kernel = functools.partial(_layer_norm_kernel, float(eps), int(D))

    # Pipelined footprint: x (x2 buffers) + out (x2 buffers) + resident gamma/beta.
    footprint = 4 * tm * Dp * itemsize + 4 * Dp * 4 + (1 << 20)
    vmem_limit = int(min(max(footprint, 32 << 20), 48 << 20))

    out = pl.pallas_call(
        kernel,
        out_shape=jax.ShapeDtypeStruct((Np, Dp), x.dtype),
        grid=(n_steps,),
        in_specs=[
            pl.BlockSpec((tm, Dp), lambda i: (i, 0)),   # x row tile
            pl.BlockSpec((1, Dp), lambda i: (0, 0)),    # gamma (resident)
            pl.BlockSpec((1, Dp), lambda i: (0, 0)),    # beta  (resident)
        ],
        out_specs=pl.BlockSpec((tm, Dp), lambda i: (i, 0)),
        compiler_params=pltpu.CompilerParams(
            dimension_semantics=("parallel",),          # rows independent -> 2 TCs on v7x
            vmem_limit_bytes=vmem_limit),
    )(x2, g2, b2)

    return out[:N, :D].reshape(orig_shape)


def _ref_layer_norm(x, a_2, b_2, eps):
    """Pure-JAX reference matching the torch module semantics."""
    d = x.shape[-1]
    mean = x.mean(-1, keepdims=True)
    var = ((x - mean) ** 2).sum(-1, keepdims=True) / max(d - 1, 1)  # unbiased
    std = jnp.sqrt(var)
    return a_2 * (x - mean) / (std + eps) + b_2


if __name__ == "__main__":
    key = jax.random.PRNGKey(0)
    eps = 1e-6

    # Small shape consistent with the module: batch=2, seq=8, hidden=32.
    B, S, D = 2, 8, 32
    k1, k2, k3, k4, k5 = jax.random.split(key, 5)
    x = jax.random.normal(k1, (B, S, D), dtype=jnp.float32)
    a_2 = 1.0 + 0.1 * jax.random.normal(k2, (D,), dtype=jnp.float32)
    b_2 = 0.1 * jax.random.normal(k3, (D,), dtype=jnp.float32)

    out = layer_norm(x, a_2, b_2, eps=eps)
    jax.block_until_ready(out)
    ref = _ref_layer_norm(x, a_2, b_2, eps)
    assert out.shape == x.shape
    assert jnp.allclose(out, ref, atol=1e-5, rtol=1e-5), "mismatch vs reference"

    # Larger lane-dense shape to exercise the multi-step (parallel) path.
    B2, S2, D2 = 8, 64, 128
    x_big = jax.random.normal(k4, (B2, S2, D2), dtype=jnp.float32)
    a_big = 1.0 + 0.05 * jax.random.normal(k2, (D2,), dtype=jnp.float32)
    b_big = 0.05 * jax.random.normal(k3, (D2,), dtype=jnp.float32)
    out_big = layer_norm(x_big, a_big, b_big, eps=eps)
    jax.block_until_ready(out_big)
    ref_big = _ref_layer_norm(x_big, a_big, b_big, eps)
    assert jnp.allclose(out_big, ref_big, atol=1e-5, rtol=1e-5), "mismatch (tiled)"

    # Odd shape: exercises both D padding (48 -> 128) and row padding (21 -> 24).
    B3, S3, D3 = 3, 7, 48
    x_odd = jax.random.normal(k5, (B3, S3, D3), dtype=jnp.float32)
    a_odd = 1.0 + 0.1 * jax.random.normal(k2, (D3,), dtype=jnp.float32)
    b_odd = 0.1 * jax.random.normal(k3, (D3,), dtype=jnp.float32)
    out_odd = layer_norm(x_odd, a_odd, b_odd, eps=eps)
    jax.block_until_ready(out_odd)
    ref_odd = _ref_layer_norm(x_odd, a_odd, b_odd, eps)
    assert jnp.allclose(out_odd, ref_odd, atol=1e-5, rtol=1e-5), "mismatch (padded)"

    print("KERNEL_OK")
</pallas_src>

<mosaic_0001>
module attributes {stable_mosaic.version = 11 : i64} {
  func.func @_layer_norm_kernel(%arg0: i32, %arg1: memref<8x128xf32, #tpu.memory_space<vmem>>, %arg2: memref<1x128xf32, #tpu.memory_space<vmem>>, %arg3: memref<1x128xf32, #tpu.memory_space<vmem>>, %arg4: memref<8x128xf32, #tpu.memory_space<vmem>>) attributes {dimension_semantics = [#tpu.dimension_semantics<parallel>], iteration_bounds = array<i64: 2>, scalar_prefetch = 0 : i64, scratch_operands = 0 : i64, tpu.core_type = #tpu.core_type<tc>, window_params = [{transform_indices = @transform_0, window_bounds = array<i64: 8, 128>}, {pipeline_mode = #tpu.pipeline_mode<synchronous>, transform_indices = @transform_1, window_bounds = array<i64: 1, 128>}, {pipeline_mode = #tpu.pipeline_mode<synchronous>, transform_indices = @transform_2, window_bounds = array<i64: 1, 128>}, {transform_indices = @transform_3, window_bounds = array<i64: 8, 128>}]} {
    %c0 = arith.constant 0 : index
    %c0_0 = arith.constant 0 : index
    %0 = vector.load %arg1[%c0, %c0_0] : memref<8x128xf32, #tpu.memory_space<vmem>>, vector<8x128xf32>
    %cst = arith.constant dense<0.000000e+00> : vector<8xf32>
    %1 = vector.multi_reduction <add>, %0, %cst [1] : vector<8x128xf32> to vector<8xf32>
    %2 = vector.shape_cast %1 : vector<8xf32> to vector<8x1xf32>
    %cst_1 = arith.constant 3.125000e-02 : f32
    %3 = vector.broadcast %cst_1 : f32 to vector<8x1xf32>
    %4 = arith.mulf %2, %3 : vector<8x1xf32>
    %5 = vector.broadcast %4 : vector<8x1xf32> to vector<8x128xf32>
    %6 = arith.subf %0, %5 : vector<8x128xf32>
    %7 = tpu.iota {dimensions = array<i32: 1>} : vector<8x128xi32>
    %c32_i32 = arith.constant 32 : i32
    %8 = vector.broadcast %c32_i32 : i32 to vector<8x128xi32>
    %9 = arith.cmpi slt, %7, %8 : vector<8x128xi32>
    %10 = arith.mulf %6, %6 : vector<8x128xf32>
    %cst_2 = arith.constant 0.000000e+00 : f32
    %11 = vector.broadcast %cst_2 : f32 to vector<8x128xf32>
    %12 = arith.select %9, %10, %11 : vector<8x128xi1>, vector<8x128xf32>
    %cst_3 = arith.constant dense<0.000000e+00> : vector<8xf32>
    %13 = vector.multi_reduction <add>, %12, %cst_3 [1] : vector<8x128xf32> to vector<8xf32>
    %14 = vector.shape_cast %13 : vector<8xf32> to vector<8x1xf32>
    %cst_4 = arith.constant 0.0322580636 : f32
    %15 = vector.broadcast %cst_4 : f32 to vector<8x1xf32>
    %16 = arith.mulf %14, %15 : vector<8x1xf32>
    %17 = math.sqrt %16 : vector<8x1xf32>
    %cst_5 = arith.constant 9.99999997E-7 : f32
    %18 = vector.broadcast %cst_5 : f32 to vector<8x1xf32>
    %19 = arith.addf %17, %18 : vector<8x1xf32>
    %cst_6 = arith.constant 1.000000e+00 : f32
    %20 = vector.broadcast %cst_6 : f32 to vector<8x1xf32>
    %21 = arith.divf %20, %19 : vector<8x1xf32>
    %22 = vector.broadcast %21 : vector<8x1xf32> to vector<8x128xf32>
    %23 = arith.mulf %6, %22 : vector<8x128xf32>
    %c0_7 = arith.constant 0 : index
    %c0_8 = arith.constant 0 : index
    %24 = vector.load %arg2[%c0_7, %c0_8] : memref<1x128xf32, #tpu.memory_space<vmem>>, vector<1x128xf32>
    %25 = vector.broadcast %24 : vector<1x128xf32> to vector<8x128xf32>
    %26 = arith.mulf %23, %25 : vector<8x128xf32>
    %c0_9 = arith.constant 0 : index
    %c0_10 = arith.constant 0 : index
    %27 = vector.load %arg3[%c0_9, %c0_10] : memref<1x128xf32, #tpu.memory_space<vmem>>, vector<1x128xf32>
    %28 = vector.broadcast %27 : vector<1x128xf32> to vector<8x128xf32>
    %29 = arith.addf %26, %28 : vector<8x128xf32>
    %c0_11 = arith.constant 0 : index
    %c0_12 = arith.constant 0 : index
    %30 = vector.load %arg4[%c0_11, %c0_12] : memref<8x128xf32, #tpu.memory_space<vmem>>, vector<8x128xf32>
    tpu.vector_store %arg4[%c0_11, %c0_12], %29 {strides = array<i32>} : memref<8x128xf32, #tpu.memory_space<vmem>>, vector<8x128xf32>,
    return
  }
  func.func @transform_0(%arg0: i32) -> (i32, i32) {
    %c0_i32 = arith.constant 0 : i32
    %c0_i32_0 = arith.constant 0 : i32
    return %arg0, %c0_i32 : i32, i32
  }
  func.func @transform_1(%arg0: i32) -> (i32, i32) {
    %c0_i32 = arith.constant 0 : i32
    %c0_i32_0 = arith.constant 0 : i32
    %c0_i32_1 = arith.constant 0 : i32
    return %c0_i32, %c0_i32_0 : i32, i32
  }
  func.func @transform_2(%arg0: i32) -> (i32, i32) {
    %c0_i32 = arith.constant 0 : i32
    %c0_i32_0 = arith.constant 0 : i32
    %c0_i32_1 = arith.constant 0 : i32
    return %c0_i32, %c0_i32_0 : i32, i32
  }
  func.func @transform_3(%arg0: i32) -> (i32, i32) {
    %c0_i32 = arith.constant 0 : i32
    %c0_i32_0 = arith.constant 0 : i32
    return %arg0, %c0_i32 : i32, i32
  }
}

</mosaic_0001>

<bundles_post_ra>
// kernel: tpu_custom_call.1
= control target key start
LH: loop header
LB: loop body
LE: loop exit
PB: predicated region body
PF: predicated region fallthrough
CT: control target
= control target key end

     0   :  { %8 = vsyncpa [#allocation3], 0  ;;  %s642_s0 = inlined_call_operand.hbm [shape: f32[16,128], index: 0, kind: input, shape index: {}]   ;;  %s643_s1 = inlined_call_operand.vmem [shape: f32[1,128], index: 1, kind: input, shape index: {}]   ;;  %s644_s2 = inlined_call_operand.vmem [shape: f32[1,128], index: 2, kind: input, shape index: {}]   ;;  %s645_s3 = inlined_call_operand.hbm [shape: f32[16,128], index: 3, kind: output, shape index: {}]  }
   0x1   :  { %10 = vsyncpa [#allocation3 + $0x1], 0 }
   0x2   :  { %11 = vsyncpa [#allocation4], 0 }
   0x3   :  { %13 = vsyncpa [#allocation4 + $0x1], 0  ;;  %s491_s12 = smov 0   ;;  %s493_s13 = smov 0  }
   0x4   :  { %s495_s14 = smov 0   ;;  %s497_s15 = smov 0  }
   0x5 LB: > { %s512_s16 = sadd.s32 4294967295, %s467_s15   ;;  %s311_s17 = sadd.s32 4294967294, %s467_s15   ;;  %s467_s15 = sphi %s497_s15, %s662_s15   ;;  %s463_s14 = sphi %s495_s14, %s661_s14   ;;  %s459_s13 = sphi %s493_s13, %s660_s13   ;;  %s455_s12 = sphi %s491_s12, %s659_s12  }
   0x6   : > { %s516_s18 = sadd.s32 1, %s467_s15   ;;  %s26_s19 = sadd.s32 1, %s463_s14 }
   0x7   : > { %s23_s20 = ssub.s32 %s467_s15, %s516_s18  ;;  %p33_p0 = scmp.ne.s32.totalorder %s463_s14, %s459_s13 }
   0x8   : > { %p24_p1 = scmp.eq.s32.totalorder %s23_s20, 0  ;;  %p34_p2 = scmp.eq.s32.totalorder %s467_s15, 0 }
   0x9   : > { %p39_p3 = scmp.ne.s32.totalorder %s459_s13, %s455_s12  ;;  %p40_p4 = scmp.eq.s32.totalorder %s512_s16, 0 }
   0xa   : > { %s528_s21 = scalar_select %p24_p1, %s463_s14, %s26_s19  }
   0xb   : > { %p530_p5 = por %p34_p2, %p33_p0  ;;  %p534_p6 = por %p40_p4, %p39_p3 }
   0xc   : > { %p105_p7 = scmp.eq.s32.totalorder %s512_s16, 1  ;;  %p111_p8 = scmp.eq.s32.totalorder %s311_s17, 1 }
   0xd   : > { %s649_s23 = scalar_select %p534_p6, 1, 0 }
   0xe   : > { %p337_p10 = scmp.lt.s32.totalorder %s467_s15, 2  ;;  %p541_p11 = por %p105_p7, %p33_p0 }
   0xf   : > { %p545_p12 = por %p111_p8, %p39_p3  ;;  %s137_s26 = sand.u32 1, %s463_s14  }
  0x10   : > { %s650_s24 = scalar_select %p541_p11, 1, 0 }
  0x11   : > { %s651_s25 = scalar_select %p545_p12, 1, 0 }
  0x12   : > { %s315_s27 = sshll.u32 %s467_s15, 7  ;;  %s314_s28 = sshll.u32 %s137_s26, 3 }
  0x13   : > { %s554_s4 = scalar_lea.hbm %s642_s0, %s315_s27  ;;  %s141_s5 = scalar_lea.vmem [#allocation2], %s314_s28 }
  0x14   : > { %s148_s6 = sshll.u32 %s141_s5, 4  ;;  %p558_p13 = pnand %p337_p10, %p530_p5  ;;  %s562_s6 = int_to_ptr.vmem [resolvable:$true] %s148_s6 }
  0x15   : > { %s138_s8 = scalar_lea.sflag [#allocation3], %s137_s26  ;;  %s375_s9 = scalar_lea.hbm %s554_s4, 128 }
  0x16   : > { %p376_p2 = scmp.ne.s32.totalorder %s554_s4, %s375_s9  ;;  %p377_p3 = pneg %p558_p13 }
  0x17   : > { %s380_s17 = scalar_lea.hbm %s642_s0, 256  ;;  %p381_p5 = scmp.lt.s32.totalorder %s554_s4, %s642_s0 }
  0x18   : > { %p378_p4 = pnand %p377_p3, %p376_p2  ;;  %p382_p8 = scmp.lt.s32.totalorder %s380_s17, %s375_s9 }
  0x1a   : > { %p379_p7 = pneg %p378_p4  ;;  %p383_p10 = por %p382_p8, %p381_p5 }
  0x1c   : > { %p384_p9 = pnand %p383_p10, %p379_p7 }
  0x1e   : > { %387 = shalt.err (!%p384_p9)
}
  0x1f   : > { %s388_s22 = scalar_lea.vmem %s562_s6, 128  ;;  %s469_s26 = smov [#allocation2]  }
  0x20   : > { %p389_p0 = scmp.ne.s32.totalorder %s562_s6, %s388_s22  ;;  %s393_s27 = sshll.u32 %s469_s26, 4  ;;  %s394_s27 = int_to_ptr.vmem [resolvable:$false] %s393_s27 }
  0x21   : > { %s395_s28 = scalar_lea.vmem %s394_s27, 256  ;;  %p396_p4 = scmp.lt.s32.totalorder %s562_s6, %s394_s27 }
  0x22   : > { %p391_p1 = pnand %p389_p0, %p377_p3  ;;  %p397_p12 = scmp.lt.s32.totalorder %s395_s28, %s388_s22 }
  0x24   : > { %p392_p2 = pneg %p391_p1  ;;  %p398_p11 = por %p397_p12, %p396_p4 }
  0x26   : > { %p399_p6 = pnand %p398_p11, %p392_p2 }
  0x28   : > { %402 = shalt.err (!%p399_p6)
}
  0x29   : > { %332 = dma.hbm_to_vmem [thread:$0]  (!%p558_p13), %s554_s4, 128, %s562_s6, %s138_s8  }
  0x2a   : > { %p653_p9 = scmp.lt.s32.totalorder %s467_s15, 3  ;;  %p654_p7 = scmp.ge.s32.totalorder %s467_s15, 1 }
  0x2c   : > { %p154_p0 = pnand %p654_p7, %p653_p9 }
  0x2d   : > { %s589_s29 = sand.u32 (!%p154_p0), 1, %s459_s13   ;;  %p655_p6 = scmp.ne.s32.totalorder (!%p154_p0), %s649_s23, 0 }
  0x2e   : > { %157 = sbr.rel (%p154_p0) target bundleno = 391 (0x187), region = 32  ;;  %s317_s30 = sshll.u32 (!%p154_p0), %s589_s29, 3 }
  0x2f   : > { %s160_s5 = scalar_lea.sflag (!%p154_p0), [#allocation3], %s589_s29  ;;  %s163_s7 = scalar_lea.vmem (!%p154_p0), [#allocation2], %s317_s30 }
  0x33   : > { %446 = dma.done.wait (%p655_p6), %s160_s5, 128  }
  0x34   : > { %448 = vsyncadd (%p655_p6), %s160_s5, 4294967168  ;;  %v186_v0 = vld [vmem:[%s163_s7] sm:$0xff]  ;;  %v191_v1 = vlaneseq  ;;  %s322_s9 = sshll.u32 %s512_s16, 7  ;;  %s185_s10 = scalar_lea.vmem [#allocation5], %s317_s30 }
  0x35   : > { %187 = vadd.xlane.f32.xlu0 %v186_v0  ;;  %v319_v17 = vld [vmem:[%s643_s1] ss:$0 sm:$0xff]  ;;  %s241_s11 = sshll.u32 %s185_s10, 4  ;;  %s239_s20 = scalar_lea.hbm %s645_s3, %s322_s9  ;;  %s242_s11 = int_to_ptr.vmem [resolvable:$true] %s241_s11 }
  0x36   : > { %v192_v3 = vand.u32 127, %v191_v1  ;;  %v320_v19 = vld [vmem:[%s644_s2] ss:$0 sm:$0xff]  ;;  %s228_s22 = scalar_lea.sflag [#allocation4], %s589_s29  ;;  %s403_s26 = scalar_lea.vmem %s242_s11, 128 }
  0x37   : > { %p404_p11 = scmp.ne.s32.totalorder %s242_s11, %s403_s26  ;;  %p656_p12 = scmp.ne.s32.totalorder %s650_s24, 0 }
  0x38   : > { %vm193_vm0 = vcmp.lt.s32.totalorder %v192_v3, 32  ;;  %s470_s27 = smov [#allocation5]  }
  0x39   : > { %p405_p13 = pnand %p404_p11, %p656_p12  ;;  %s407_s28 = sshll.u32 %s470_s27, 4  ;;  %s408_s28 = int_to_ptr.vmem [resolvable:$false] %s407_s28 }
  0x3a   : > { %s409_s16 = scalar_lea.vmem %s408_s28, 256  ;;  %p410_p3 = scmp.lt.s32.totalorder %s242_s11, %s408_s28 }
  0x3b   : > { %p406_p1 = pneg %p405_p13  ;;  %p411_p5 = scmp.lt.s32.totalorder %s409_s16, %s403_s26 }
  0x3d   : > { %p412_p8 = por %p411_p5, %p410_p3 }
  0x3f   : > { %p413_p10 = pnand %p412_p8, %p406_p1 }
  0xbe   : > { %v188_v2 = vpop.xlane.xlu0 %187 }
  0xbf   : > { %v189_v4 = vmul.f32 0.03125, %v188_v2 }
  0xc1   : > { %v190_v5 = vsub.f32 %v186_v0, %v189_v4 }
  0xc3   : > { %v194_v6 = vmul.f32 %v190_v5, %v190_v5 }
  0xc5   : > { %v195_v7 = vsel %vm193_vm0, %v194_v6, 0.0 }
  0xc6   : > { %196 = vadd.xlane.f32.xlu0 %v195_v7 }
 0x14f   : > { %v197_v8 = vpop.xlane.xlu0 %196 }
 0x150   : > { %v198_v9 = vmul.f32 0.032258064, %v197_v8 }
 0x152   : > { %371 = vrsqrt.f32 %v198_v9  ;;  %vm201_vm1 = vcmp.eq.f32.partialorder %v198_v9, inf  ;;  %v204_v12 = vand.u32 2147483648, %v198_v9  ;;  %vm203_vm2 = vcmp.eq.f32.partialorder %v198_v9, 0.0 }
 0x15f   : > { %v372_v10 = vpop.eup %371 }
 0x160   : > { %v200_v11 = vmul.f32 %v372_v10, %v198_v9 }
 0x162   : > { %v202_v13 = vsel %vm201_vm1, %v198_v9, %v200_v11 }
 0x163   : > { %v205_v14 = vsel %vm203_vm2, %v204_v12, %v202_v13 }
 0x164   : > { %v206_v15 = vadd.f32 1e-06, %v205_v14 }
 0x166   : > { %373 = vrcp.f32 %v206_v15 }
 0x173   : > { %v374_v16 = vpop.eup %373 }
 0x174   : > { %v209_v18 = vmul.f32 %v374_v16, %v190_v5 }
 0x176   : > { %v217_v20 = vmul.f32 %v319_v17, %v209_v18 }
 0x178   : > { %v225_v21 = vadd.f32 %v320_v19, %v217_v20 }
 0x17a   : > { %226 = vst [vmem:[%s185_s10] sm:$0xff] %v225_v21 }
 0x17b   : > { %416 = shalt.err (!%p413_p10)
}
 0x17c   : > { %s417_s30 = scalar_lea.hbm %s239_s20, 128  ;;  %s421_s7 = scalar_lea.hbm %s645_s3, 256 }
 0x17d   : > { %p418_p2 = scmp.ne.s32.totalorder %s239_s20, %s417_s30  ;;  %p422_p7 = scmp.lt.s32.totalorder %s239_s20, %s645_s3 }
 0x17e   : > { %p423_p0 = scmp.lt.s32.totalorder %s421_s7, %s417_s30 }
 0x17f   : > { %p419_p4 = pnand %p418_p2, %p656_p12 }
 0x180   : > { %p424_p6 = por %p423_p0, %p422_p7 }
 0x181   : > { %p420_p9 = pneg %p419_p4 }
 0x183   : > { %p425_p11 = pnand %p424_p6, %p420_p9 }
 0x185   : > { %428 = shalt.err (!%p425_p11)
}
 0x186   : > { %327 = dma.vmem_to_hbm [thread:$0]  (%p656_p12), %s242_s11, 128, %s239_s20, %s228_s22  }
 0x187 PF: > { %s253_s6 = sand.u32 1, %s455_s12   ;;  %p657_p13 = scmp.ne.s32.totalorder %s651_s25, 0 }
 0x188   : > { %p658_p1 = scmp.ge.s32.totalorder %s467_s15, 2  ;;  %s254_s8 = scalar_lea.sflag [#allocation4], %s253_s6 }
 0x18a   : > { %p334_p3 = pnand %p658_p1, %p657_p13 }
 0x18c   : > { %p335_p5 = pneg %p334_p3 }
 0x18e   : > { %450 = dma.done.wait (%p335_p5), %s254_s8, 128  }
 0x18f   : > { %452 = vsyncadd (%p335_p5), %s254_s8, 4294967168  ;;  %p16_p8 = scmp.ge.s32.totalorder %s516_s18, 4   ;;  %s659_s12 = smov %s459_s13 }
 0x190   : > { %s660_s13 = smov %s463_s14  ;;  %s661_s14 = smov %s528_s21 }
 0x191   : > { %s662_s15 = smov %s516_s18  ;;  %18 = sbr.rel (!%p16_p8) target bundleno = 5 (0x5), region = 77 }
 0x196   :  { %259 = vsyncpa [#allocation3], 1 }
 0x197   :  { %261 = vsyncpa [#allocation3 + $0x1], 1 }
 0x198   :  { %262 = vsyncpa [#allocation4], 1 }
 0x199   :  { %264 = vsyncpa [#allocation4 + $0x1], 1 }

</bundles_post_ra>
